<compile_context>
chip_gen: v7x
topology: tpu7x:2x2x1
jax: 0.10.0
libtpu: 0.0.40
codegen_flags: <defaults>
</compile_context>

<pallas_src>
import functools

import jax
import jax.numpy as jnp
from jax import lax
from jax.experimental import pallas as pl
from jax.experimental.pallas import tpu as pltpu

BN_EPS = 1e-5


def _vmem_spec():
    return pl.BlockSpec(memory_space=pltpu.MemorySpace.VMEM)


# ---------------------------------------------------------------------------
# NT-Xent loss in 2x2 block form (runs inside the fused kernel)
# ---------------------------------------------------------------------------
def _nt_xent(z1, z2, temperature):
    """NT-Xent (sum cross-entropy / 2N), matching the PyTorch reference.

    Uses the 2x2 block structure of the (2N, 2N) similarity matrix so no
    row-concatenation (sublane shuffle) or explicit transpose is needed: each
    block is a contraction on the last dims, which feeds the MXU directly.
    When both views are the same traced value (identity augmentation) all four
    blocks are equal, so only one contraction is emitted.
    """
    n = z1.shape[0]
    inv_t = 1.0 / temperature
    same_views = z1 is z2

    def l2norm(v):  # F.normalize(dim=1), eps=1e-12
        ss = jnp.sum(v * v, axis=-1, keepdims=True)
        return v * lax.rsqrt(jnp.maximum(ss, 1e-24))

    z1n = l2norm(z1)
    z2n = z1n if same_views else l2norm(z2)

    nt_dims = (((1,), (1,)), ((), ()))  # A @ B^T without materializing B^T

    def sim(a, b):
        return lax.dot_general(a, b, dimension_numbers=nt_dims,
                               preferred_element_type=jnp.float32)

    s11 = sim(z1n, z1n)                       # (N, N) view1 . view1
    if same_views:
        s12 = s21 = s22 = s11                 # trace-time dedup: one MXU op total
    else:
        s12 = sim(z1n, z2n)                   # (N, N) view1 . view2
        s21 = sim(z2n, z1n)                   # (N, N) view2 . view1
        s22 = sim(z2n, z2n)                   # (N, N) view2 . view2

    row = lax.broadcasted_iota(jnp.int32, (n, n), 0)
    col = lax.broadcasted_iota(jnp.int32, (n, n), 1)
    diag = row == col
    neg_big = jnp.float32(-1e30)  # finite mask (robust vs -inf / exp NaN)

    def take_diag(s):  # (N, N) -> (N, 1) of s[i, i]
        return jnp.sum(jnp.where(diag, s, 0.0), axis=-1, keepdims=True)

    def row_lse(a, b):  # logsumexp over the union of two row-blocks
        m = jnp.maximum(jnp.max(a, axis=-1, keepdims=True),
                        jnp.max(b, axis=-1, keepdims=True))
        return m + jnp.log(jnp.sum(jnp.exp(a - m), axis=-1, keepdims=True)
                           + jnp.sum(jnp.exp(b - m), axis=-1, keepdims=True))

    # Rows 0..N-1 (view-1): logits = [s11 (self masked), s12]; positive = diag(s12).
    lse1 = row_lse(jnp.where(diag, neg_big, s11 * inv_t), s12 * inv_t)
    per1 = lse1 - take_diag(s12) * inv_t
    # Rows N..2N-1 (view-2): logits = [s21, s22 (self masked)]; positive = diag(s21).
    lse2 = row_lse(s21 * inv_t, jnp.where(diag, neg_big, s22 * inv_t))
    per2 = lse2 - take_diag(s21) * inv_t

    total = jnp.sum(per1 + per2, axis=0, keepdims=True)        # (1, 1)
    return total * (1.0 / (2 * n))


# ---------------------------------------------------------------------------
# Single fused kernel: backbone -> projector -> NT-Xent
# ---------------------------------------------------------------------------
def simclr_fused_kernel(
    x_ref,
    bw_ref, bb_ref,          # backbone Linear (bias kept: followed by ReLU)
    w1_ref, bn1_ref,         # projector layer1: Linear weight, stacked (gamma; beta)
    w2_ref, bn2_ref,         # projector layer2
    w3_ref, bn3_ref,         # projector layer3
    loss_ref,
    *, temperature,
):
    def linear(h, w_ref):
        # Projector Linear bias is omitted: the following train-mode BatchNorm
        # subtracts the batch mean, which cancels a per-feature bias exactly.
        return jnp.dot(h, w_ref[...], preferred_element_type=jnp.float32)

    def batchnorm(y, bn_ref):
        # BatchNorm1d training mode: biased batch statistics over the batch axis.
        aff = bn_ref[...]                       # (2, d): row 0 = gamma, row 1 = beta
        gamma = aff[0:1, :]
        beta = aff[1:2, :]
        mean = jnp.mean(y, axis=0, keepdims=True)
        var = jnp.mean((y - mean) ** 2, axis=0, keepdims=True)
        return (y - mean) * lax.rsqrt(var + BN_EPS) * gamma + beta

    # ---- encoder: synthetic backbone (Linear+ReLU) then projector ----------
    x = x_ref[...].astype(jnp.float32)
    h = jnp.maximum(
        jnp.dot(x, bw_ref[...], preferred_element_type=jnp.float32) + bb_ref[...],
        0.0)
    h = jnp.maximum(batchnorm(linear(h, w1_ref), bn1_ref), 0.0)
    h = jnp.maximum(batchnorm(linear(h, w2_ref), bn2_ref), 0.0)
    z = batchnorm(linear(h, w3_ref), bn3_ref)   # (B, proj_dim)

    # Identity augmentation => both views identical: one encoder pass feeds
    # both z1 and z2; _nt_xent dedups the similarity blocks at trace time.
    loss_ref[...] = _nt_xent(z, z, temperature)


# ---------------------------------------------------------------------------
# Pallas wrapper: one pallas_call for the whole forward
# ---------------------------------------------------------------------------
def simclrv2_forward(params, x, temperature=0.5):
    # TODO(synk): torchvision stochastic augmentations (RandomResizedCrop, flip,
    # ColorJitter, grayscale, GaussianBlur) have no Pallas equivalent; both
    # views use the identity augmentation here.
    B = x.shape[0]
    x_flat = x.reshape(B, -1).astype(jnp.float32)
    args = (
        x_flat,
        params["backbone_w"], params["backbone_b"],
        params["w1"], params["bn1"],
        params["w2"], params["bn2"],
        params["w3"], params["bn3"],
    )
    # TODO(synk): at production SimCLR shapes (feature_size~2048, B>=256) this
    # should become a gridded kernel with (8,128)-aligned BlockSpec tiling,
    # bf16 MXU operands on v6e/v7x, a 'parallel' batch axis for megacore, and
    # tile sizes re-derived for v7x's 64 MiB VMEM. At these synthetic shapes
    # everything fits in VMEM, so one gridless call is optimal.
    loss = pl.pallas_call(
        functools.partial(simclr_fused_kernel, temperature=temperature),
        out_shape=jax.ShapeDtypeStruct((1, 1), jnp.float32),
        in_specs=[_vmem_spec()] * len(args),
        out_specs=_vmem_spec(),
    )(*args)
    return loss[0, 0]


# ---------------------------------------------------------------------------
# Parameters (deterministic synthetic init; shapes from the module's __init__)
# ---------------------------------------------------------------------------
def init_params(key, in_flat, feature_size, proj_dim):
    ks = jax.random.split(key, 8)
    s = 0.05

    def lin(k, din, dout):
        kw, kb = jax.random.split(k)
        return (jax.random.normal(kw, (din, dout), jnp.float32) * s,
                jax.random.normal(kb, (1, dout), jnp.float32) * s)

    bw, bb = lin(ks[0], in_flat, feature_size)
    w1, b1 = lin(ks[1], feature_size, feature_size)   # Projector hidden_dim = feature_size
    w2, b2 = lin(ks[2], feature_size, feature_size)
    w3, b3 = lin(ks[3], feature_size, proj_dim)

    def bn_affine(d):  # stacked (gamma; beta) = (ones; zeros), shape (2, d)
        return jnp.concatenate([jnp.ones((1, d), jnp.float32),
                                jnp.zeros((1, d), jnp.float32)], axis=0)

    return {
        "backbone_w": bw, "backbone_b": bb,
        # Projector Linear biases kept for the reference; the kernel drops
        # them because train-mode BatchNorm's mean subtraction cancels them.
        "w1": w1, "b1": b1, "bn1": bn_affine(feature_size),
        "w2": w2, "b2": b2, "bn2": bn_affine(feature_size),
        "w3": w3, "b3": b3, "bn3": bn_affine(proj_dim),
    }


# Pure-JAX reference for a sanity check (same math, no Pallas, biases kept).
def _reference_loss(params, x, temperature=0.5):
    B = x.shape[0]
    v = x.reshape(B, -1).astype(jnp.float32)

    def enc(v):
        h = jnp.maximum(v @ params["backbone_w"] + params["backbone_b"], 0.0)
        for i, relu in ((1, True), (2, True), (3, False)):
            y = h @ params[f"w{i}"] + params[f"b{i}"]
            g, be = params[f"bn{i}"][0:1, :], params[f"bn{i}"][1:2, :]
            m = jnp.mean(y, axis=0, keepdims=True)
            var = jnp.mean((y - m) ** 2, axis=0, keepdims=True)
            y = (y - m) / jnp.sqrt(var + BN_EPS) * g + be
            h = jnp.maximum(y, 0.0) if relu else y
        return h

    z1, z2 = enc(v), enc(v)
    n = z1.shape[0]
    norm = lambda z: z / jnp.maximum(jnp.linalg.norm(z, axis=-1, keepdims=True), 1e-12)
    reps = jnp.concatenate([norm(z1), norm(z2)], axis=0)
    sim = reps @ reps.T
    idx = jnp.arange(2 * n)
    pos = sim[idx, (idx + n) % (2 * n)]
    logits = jnp.where(jnp.eye(2 * n, dtype=bool), -jnp.inf, sim / temperature)
    lse = jax.scipy.special.logsumexp(logits, axis=-1)
    return jnp.sum(lse - pos / temperature) / (2 * n)


if __name__ == "__main__":
    key = jax.random.PRNGKey(0)
    k_x, k_p = jax.random.split(key)

    # Small synthetic shapes: batch=2, channels=4, spatial=16x16,
    # feature_size=32, projection_dim=16, temperature=0.5.
    B, C, H, W = 2, 4, 16, 16
    feature_size, proj_dim = 32, 16
    x = jax.random.normal(k_x, (B, C, H, W), jnp.float32)
    params = init_params(k_p, C * H * W, feature_size, proj_dim)

    loss = jax.jit(simclrv2_forward)(params, x)
    loss = jax.block_until_ready(loss)

    ref = _reference_loss(params, x)
    assert jnp.isfinite(loss), "loss is not finite"
    assert jnp.allclose(loss, ref, rtol=1e-3, atol=1e-3), (loss, ref)

    print("KERNEL_OK")
</pallas_src>

<mosaic_0001>
module attributes {stable_mosaic.version = 11 : i64} {
  func.func @simclr_fused_kernel(%arg0: memref<2x1024xf32, #tpu.memory_space<vmem>>, %arg1: memref<1024x32xf32, #tpu.memory_space<vmem>>, %arg2: memref<1x32xf32, #tpu.memory_space<vmem>>, %arg3: memref<32x32xf32, #tpu.memory_space<vmem>>, %arg4: memref<2x32xf32, #tpu.memory_space<vmem>>, %arg5: memref<32x32xf32, #tpu.memory_space<vmem>>, %arg6: memref<2x32xf32, #tpu.memory_space<vmem>>, %arg7: memref<32x16xf32, #tpu.memory_space<vmem>>, %arg8: memref<2x16xf32, #tpu.memory_space<vmem>>, %arg9: memref<1x1xf32, #tpu.memory_space<vmem>>) attributes {dimension_semantics = [], scalar_prefetch = 0 : i64, scratch_operands = 0 : i64, tpu.core_type = #tpu.core_type<tc>} {
    %c0 = arith.constant 0 : index
    %c0_0 = arith.constant 0 : index
    %0 = vector.load %arg0[%c0, %c0_0] : memref<2x1024xf32, #tpu.memory_space<vmem>>, vector<2x1024xf32>
    %c0_1 = arith.constant 0 : index
    %c0_2 = arith.constant 0 : index
    %1 = vector.load %arg1[%c0_1, %c0_2] : memref<1024x32xf32, #tpu.memory_space<vmem>>, vector<1024x32xf32>
    %cst = arith.constant dense<0.000000e+00> : vector<2x32xf32>
    %2 = tpu.matmul %0, %1, %cst {dimension_numbers = #tpu.dot_dimension_numbers<[1], [0], [0], [1], [0, 0, 1, 1], [], []>} : vector<2x1024xf32>, vector<1024x32xf32>, vector<2x32xf32> -> vector<2x32xf32>
    %c0_3 = arith.constant 0 : index
    %c0_4 = arith.constant 0 : index
    %3 = vector.load %arg2[%c0_3, %c0_4] : memref<1x32xf32, #tpu.memory_space<vmem>>, vector<1x32xf32>
    %4 = vector.broadcast %3 : vector<1x32xf32> to vector<2x32xf32>
    %5 = arith.addf %2, %4 : vector<2x32xf32>
    %cst_5 = arith.constant 0.000000e+00 : f32
    %6 = vector.broadcast %cst_5 : f32 to vector<2x32xf32>
    %7 = arith.maximumf %5, %6 : vector<2x32xf32>
    %c0_6 = arith.constant 0 : index
    %c0_7 = arith.constant 0 : index
    %8 = vector.load %arg3[%c0_6, %c0_7] : memref<32x32xf32, #tpu.memory_space<vmem>>, vector<32x32xf32>
    %cst_8 = arith.constant dense<0.000000e+00> : vector<2x32xf32>
    %9 = tpu.matmul %7, %8, %cst_8 {dimension_numbers = #tpu.dot_dimension_numbers<[1], [0], [0], [1], [0, 0, 1, 1], [], []>} : vector<2x32xf32>, vector<32x32xf32>, vector<2x32xf32> -> vector<2x32xf32>
    %c0_9 = arith.constant 0 : index
    %c0_10 = arith.constant 0 : index
    %10 = vector.load %arg4[%c0_9, %c0_10] : memref<2x32xf32, #tpu.memory_space<vmem>>, vector<2x32xf32>
    %11 = vector.extract_strided_slice %10 {offsets = [0, 0], sizes = [1, 32], strides = [1, 1]} : vector<2x32xf32> to vector<1x32xf32>
    %12 = vector.extract_strided_slice %10 {offsets = [1, 0], sizes = [1, 32], strides = [1, 1]} : vector<2x32xf32> to vector<1x32xf32>
    %cst_11 = arith.constant dense<0.000000e+00> : vector<32xf32>
    %13 = vector.multi_reduction <add>, %9, %cst_11 [0] : vector<2x32xf32> to vector<32xf32>
    %14 = vector.shape_cast %13 : vector<32xf32> to vector<1x32xf32>
    %cst_12 = arith.constant 2.000000e+00 : f32
    %15 = vector.broadcast %cst_12 : f32 to vector<1x32xf32>
    %16 = arith.divf %14, %15 : vector<1x32xf32>
    %17 = vector.broadcast %16 : vector<1x32xf32> to vector<2x32xf32>
    %18 = arith.subf %9, %17 : vector<2x32xf32>
    %19 = arith.mulf %18, %18 : vector<2x32xf32>
    %cst_13 = arith.constant dense<0.000000e+00> : vector<32xf32>
    %20 = vector.multi_reduction <add>, %19, %cst_13 [0] : vector<2x32xf32> to vector<32xf32>
    %21 = vector.shape_cast %20 : vector<32xf32> to vector<1x32xf32>
    %cst_14 = arith.constant 2.000000e+00 : f32
    %22 = vector.broadcast %cst_14 : f32 to vector<1x32xf32>
    %23 = arith.divf %21, %22 : vector<1x32xf32>
    %24 = vector.broadcast %16 : vector<1x32xf32> to vector<2x32xf32>
    %25 = arith.subf %9, %24 : vector<2x32xf32>
    %cst_15 = arith.constant 9.99999974E-6 : f32
    %26 = vector.broadcast %cst_15 : f32 to vector<1x32xf32>
    %27 = arith.addf %23, %26 : vector<1x32xf32>
    %28 = math.rsqrt %27 : vector<1x32xf32>
    %29 = vector.broadcast %28 : vector<1x32xf32> to vector<2x32xf32>
    %30 = arith.mulf %25, %29 : vector<2x32xf32>
    %31 = vector.broadcast %11 : vector<1x32xf32> to vector<2x32xf32>
    %32 = arith.mulf %30, %31 : vector<2x32xf32>
    %33 = vector.broadcast %12 : vector<1x32xf32> to vector<2x32xf32>
    %34 = arith.addf %32, %33 : vector<2x32xf32>
    %cst_16 = arith.constant 0.000000e+00 : f32
    %35 = vector.broadcast %cst_16 : f32 to vector<2x32xf32>
    %36 = arith.maximumf %34, %35 : vector<2x32xf32>
    %c0_17 = arith.constant 0 : index
    %c0_18 = arith.constant 0 : index
    %37 = vector.load %arg5[%c0_17, %c0_18] : memref<32x32xf32, #tpu.memory_space<vmem>>, vector<32x32xf32>
    %cst_19 = arith.constant dense<0.000000e+00> : vector<2x32xf32>
    %38 = tpu.matmul %36, %37, %cst_19 {dimension_numbers = #tpu.dot_dimension_numbers<[1], [0], [0], [1], [0, 0, 1, 1], [], []>} : vector<2x32xf32>, vector<32x32xf32>, vector<2x32xf32> -> vector<2x32xf32>
    %c0_20 = arith.constant 0 : index
    %c0_21 = arith.constant 0 : index
    %39 = vector.load %arg6[%c0_20, %c0_21] : memref<2x32xf32, #tpu.memory_space<vmem>>, vector<2x32xf32>
    %40 = vector.extract_strided_slice %39 {offsets = [0, 0], sizes = [1, 32], strides = [1, 1]} : vector<2x32xf32> to vector<1x32xf32>
    %41 = vector.extract_strided_slice %39 {offsets = [1, 0], sizes = [1, 32], strides = [1, 1]} : vector<2x32xf32> to vector<1x32xf32>
    %cst_22 = arith.constant dense<0.000000e+00> : vector<32xf32>
    %42 = vector.multi_reduction <add>, %38, %cst_22 [0] : vector<2x32xf32> to vector<32xf32>
    %43 = vector.shape_cast %42 : vector<32xf32> to vector<1x32xf32>
    %cst_23 = arith.constant 2.000000e+00 : f32
    %44 = vector.broadcast %cst_23 : f32 to vector<1x32xf32>
    %45 = arith.divf %43, %44 : vector<1x32xf32>
    %46 = vector.broadcast %45 : vector<1x32xf32> to vector<2x32xf32>
    %47 = arith.subf %38, %46 : vector<2x32xf32>
    %48 = arith.mulf %47, %47 : vector<2x32xf32>
    %cst_24 = arith.constant dense<0.000000e+00> : vector<32xf32>
    %49 = vector.multi_reduction <add>, %48, %cst_24 [0] : vector<2x32xf32> to vector<32xf32>
    %50 = vector.shape_cast %49 : vector<32xf32> to vector<1x32xf32>
    %cst_25 = arith.constant 2.000000e+00 : f32
    %51 = vector.broadcast %cst_25 : f32 to vector<1x32xf32>
    %52 = arith.divf %50, %51 : vector<1x32xf32>
    %53 = vector.broadcast %45 : vector<1x32xf32> to vector<2x32xf32>
    %54 = arith.subf %38, %53 : vector<2x32xf32>
    %cst_26 = arith.constant 9.99999974E-6 : f32
    %55 = vector.broadcast %cst_26 : f32 to vector<1x32xf32>
    %56 = arith.addf %52, %55 : vector<1x32xf32>
    %57 = math.rsqrt %56 : vector<1x32xf32>
    %58 = vector.broadcast %57 : vector<1x32xf32> to vector<2x32xf32>
    %59 = arith.mulf %54, %58 : vector<2x32xf32>
    %60 = vector.broadcast %40 : vector<1x32xf32> to vector<2x32xf32>
    %61 = arith.mulf %59, %60 : vector<2x32xf32>
    %62 = vector.broadcast %41 : vector<1x32xf32> to vector<2x32xf32>
    %63 = arith.addf %61, %62 : vector<2x32xf32>
    %cst_27 = arith.constant 0.000000e+00 : f32
    %64 = vector.broadcast %cst_27 : f32 to vector<2x32xf32>
    %65 = arith.maximumf %63, %64 : vector<2x32xf32>
    %c0_28 = arith.constant 0 : index
    %c0_29 = arith.constant 0 : index
    %66 = vector.load %arg7[%c0_28, %c0_29] : memref<32x16xf32, #tpu.memory_space<vmem>>, vector<32x16xf32>
    %cst_30 = arith.constant dense<0.000000e+00> : vector<2x16xf32>
    %67 = tpu.matmul %65, %66, %cst_30 {dimension_numbers = #tpu.dot_dimension_numbers<[1], [0], [0], [1], [0, 0, 1, 1], [], []>} : vector<2x32xf32>, vector<32x16xf32>, vector<2x16xf32> -> vector<2x16xf32>
    %c0_31 = arith.constant 0 : index
    %c0_32 = arith.constant 0 : index
    %68 = vector.load %arg8[%c0_31, %c0_32] : memref<2x16xf32, #tpu.memory_space<vmem>>, vector<2x16xf32>
    %69 = vector.extract_strided_slice %68 {offsets = [0, 0], sizes = [1, 16], strides = [1, 1]} : vector<2x16xf32> to vector<1x16xf32>
    %70 = vector.extract_strided_slice %68 {offsets = [1, 0], sizes = [1, 16], strides = [1, 1]} : vector<2x16xf32> to vector<1x16xf32>
    %cst_33 = arith.constant dense<0.000000e+00> : vector<16xf32>
    %71 = vector.multi_reduction <add>, %67, %cst_33 [0] : vector<2x16xf32> to vector<16xf32>
    %72 = vector.shape_cast %71 : vector<16xf32> to vector<1x16xf32>
    %cst_34 = arith.constant 2.000000e+00 : f32
    %73 = vector.broadcast %cst_34 : f32 to vector<1x16xf32>
    %74 = arith.divf %72, %73 : vector<1x16xf32>
    %75 = vector.broadcast %74 : vector<1x16xf32> to vector<2x16xf32>
    %76 = arith.subf %67, %75 : vector<2x16xf32>
    %77 = arith.mulf %76, %76 : vector<2x16xf32>
    %cst_35 = arith.constant dense<0.000000e+00> : vector<16xf32>
    %78 = vector.multi_reduction <add>, %77, %cst_35 [0] : vector<2x16xf32> to vector<16xf32>
    %79 = vector.shape_cast %78 : vector<16xf32> to vector<1x16xf32>
    %cst_36 = arith.constant 2.000000e+00 : f32
    %80 = vector.broadcast %cst_36 : f32 to vector<1x16xf32>
    %81 = arith.divf %79, %80 : vector<1x16xf32>
    %82 = vector.broadcast %74 : vector<1x16xf32> to vector<2x16xf32>
    %83 = arith.subf %67, %82 : vector<2x16xf32>
    %cst_37 = arith.constant 9.99999974E-6 : f32
    %84 = vector.broadcast %cst_37 : f32 to vector<1x16xf32>
    %85 = arith.addf %81, %84 : vector<1x16xf32>
    %86 = math.rsqrt %85 : vector<1x16xf32>
    %87 = vector.broadcast %86 : vector<1x16xf32> to vector<2x16xf32>
    %88 = arith.mulf %83, %87 : vector<2x16xf32>
    %89 = vector.broadcast %69 : vector<1x16xf32> to vector<2x16xf32>
    %90 = arith.mulf %88, %89 : vector<2x16xf32>
    %91 = vector.broadcast %70 : vector<1x16xf32> to vector<2x16xf32>
    %92 = arith.addf %90, %91 : vector<2x16xf32>
    %93 = arith.mulf %92, %92 : vector<2x16xf32>
    %cst_38 = arith.constant dense<0.000000e+00> : vector<2xf32>
    %94 = vector.multi_reduction <add>, %93, %cst_38 [1] : vector<2x16xf32> to vector<2xf32>
    %95 = vector.shape_cast %94 : vector<2xf32> to vector<2x1xf32>
    %cst_39 = arith.constant 1.000000e-24 : f32
    %96 = vector.broadcast %cst_39 : f32 to vector<2x1xf32>
    %97 = arith.maximumf %95, %96 : vector<2x1xf32>
    %98 = math.rsqrt %97 : vector<2x1xf32>
    %99 = vector.broadcast %98 : vector<2x1xf32> to vector<2x16xf32>
    %100 = arith.mulf %92, %99 : vector<2x16xf32>
    %cst_40 = arith.constant dense<0.000000e+00> : vector<2x2xf32>
    %101 = tpu.matmul %100, %100, %cst_40 {dimension_numbers = #tpu.dot_dimension_numbers<[1], [1], [0], [0], [0, 0, 1, 0], [], []>} : vector<2x16xf32>, vector<2x16xf32>, vector<2x2xf32> -> vector<2x2xf32>
    %102 = tpu.iota {dimensions = array<i32: 0>} : vector<2x2xi32>
    %103 = tpu.iota {dimensions = array<i32: 1>} : vector<2x2xi32>
    %104 = arith.cmpi eq, %102, %103 : vector<2x2xi32>
    %cst_41 = arith.constant 2.000000e+00 : f32
    %105 = vector.broadcast %cst_41 : f32 to vector<2x2xf32>
    %106 = arith.mulf %101, %105 : vector<2x2xf32>
    %cst_42 = arith.constant -1.000000e+30 : f32
    %107 = vector.broadcast %cst_42 : f32 to vector<2x2xf32>
    %108 = arith.select %104, %107, %106 : vector<2x2xi1>, vector<2x2xf32>
    %cst_43 = arith.constant 2.000000e+00 : f32
    %109 = vector.broadcast %cst_43 : f32 to vector<2x2xf32>
    %110 = arith.mulf %101, %109 : vector<2x2xf32>
    %cst_44 = arith.constant dense<0xFF800000> : vector<2xf32>
    %111 = vector.multi_reduction <maximumf>, %108, %cst_44 [1] : vector<2x2xf32> to vector<2xf32>
    %112 = vector.shape_cast %111 : vector<2xf32> to vector<2x1xf32>
    %cst_45 = arith.constant dense<0xFF800000> : vector<2xf32>
    %113 = vector.multi_reduction <maximumf>, %110, %cst_45 [1] : vector<2x2xf32> to vector<2xf32>
    %114 = vector.shape_cast %113 : vector<2xf32> to vector<2x1xf32>
    %115 = arith.maximumf %112, %114 : vector<2x1xf32>
    %116 = vector.broadcast %115 : vector<2x1xf32> to vector<2x2xf32>
    %117 = arith.subf %108, %116 : vector<2x2xf32>
    %118 = math.exp %117 : vector<2x2xf32>
    %cst_46 = arith.constant dense<0.000000e+00> : vector<2xf32>
    %119 = vector.multi_reduction <add>, %118, %cst_46 [1] : vector<2x2xf32> to vector<2xf32>
    %120 = vector.shape_cast %119 : vector<2xf32> to vector<2x1xf32>
    %121 = vector.broadcast %115 : vector<2x1xf32> to vector<2x2xf32>
    %122 = arith.subf %110, %121 : vector<2x2xf32>
    %123 = math.exp %122 : vector<2x2xf32>
    %cst_47 = arith.constant dense<0.000000e+00> : vector<2xf32>
    %124 = vector.multi_reduction <add>, %123, %cst_47 [1] : vector<2x2xf32> to vector<2xf32>
    %125 = vector.shape_cast %124 : vector<2xf32> to vector<2x1xf32>
    %126 = arith.addf %120, %125 : vector<2x1xf32>
    %127 = math.log %126 : vector<2x1xf32>
    %128 = arith.addf %115, %127 : vector<2x1xf32>
    %cst_48 = arith.constant 0.000000e+00 : f32
    %129 = vector.broadcast %cst_48 : f32 to vector<2x2xf32>
    %130 = arith.select %104, %101, %129 : vector<2x2xi1>, vector<2x2xf32>
    %cst_49 = arith.constant dense<0.000000e+00> : vector<2xf32>
    %131 = vector.multi_reduction <add>, %130, %cst_49 [1] : vector<2x2xf32> to vector<2xf32>
    %132 = vector.shape_cast %131 : vector<2xf32> to vector<2x1xf32>
    %cst_50 = arith.constant 2.000000e+00 : f32
    %133 = vector.broadcast %cst_50 : f32 to vector<2x1xf32>
    %134 = arith.mulf %132, %133 : vector<2x1xf32>
    %135 = arith.subf %128, %134 : vector<2x1xf32>
    %cst_51 = arith.constant 2.000000e+00 : f32
    %136 = vector.broadcast %cst_51 : f32 to vector<2x2xf32>
    %137 = arith.mulf %101, %136 : vector<2x2xf32>
    %cst_52 = arith.constant 2.000000e+00 : f32
    %138 = vector.broadcast %cst_52 : f32 to vector<2x2xf32>
    %139 = arith.mulf %101, %138 : vector<2x2xf32>
    %cst_53 = arith.constant -1.000000e+30 : f32
    %140 = vector.broadcast %cst_53 : f32 to vector<2x2xf32>
    %141 = arith.select %104, %140, %139 : vector<2x2xi1>, vector<2x2xf32>
    %cst_54 = arith.constant dense<0xFF800000> : vector<2xf32>
    %142 = vector.multi_reduction <maximumf>, %137, %cst_54 [1] : vector<2x2xf32> to vector<2xf32>
    %143 = vector.shape_cast %142 : vector<2xf32> to vector<2x1xf32>
    %cst_55 = arith.constant dense<0xFF800000> : vector<2xf32>
    %144 = vector.multi_reduction <maximumf>, %141, %cst_55 [1] : vector<2x2xf32> to vector<2xf32>
    %145 = vector.shape_cast %144 : vector<2xf32> to vector<2x1xf32>
    %146 = arith.maximumf %143, %145 : vector<2x1xf32>
    %147 = vector.broadcast %146 : vector<2x1xf32> to vector<2x2xf32>
    %148 = arith.subf %137, %147 : vector<2x2xf32>
    %149 = math.exp %148 : vector<2x2xf32>
    %cst_56 = arith.constant dense<0.000000e+00> : vector<2xf32>
    %150 = vector.multi_reduction <add>, %149, %cst_56 [1] : vector<2x2xf32> to vector<2xf32>
    %151 = vector.shape_cast %150 : vector<2xf32> to vector<2x1xf32>
    %152 = vector.broadcast %146 : vector<2x1xf32> to vector<2x2xf32>
    %153 = arith.subf %141, %152 : vector<2x2xf32>
    %154 = math.exp %153 : vector<2x2xf32>
    %cst_57 = arith.constant dense<0.000000e+00> : vector<2xf32>
    %155 = vector.multi_reduction <add>, %154, %cst_57 [1] : vector<2x2xf32> to vector<2xf32>
    %156 = vector.shape_cast %155 : vector<2xf32> to vector<2x1xf32>
    %157 = arith.addf %151, %156 : vector<2x1xf32>
    %158 = math.log %157 : vector<2x1xf32>
    %159 = arith.addf %146, %158 : vector<2x1xf32>
    %cst_58 = arith.constant 0.000000e+00 : f32
    %160 = vector.broadcast %cst_58 : f32 to vector<2x2xf32>
    %161 = arith.select %104, %101, %160 : vector<2x2xi1>, vector<2x2xf32>
    %cst_59 = arith.constant dense<0.000000e+00> : vector<2xf32>
    %162 = vector.multi_reduction <add>, %161, %cst_59 [1] : vector<2x2xf32> to vector<2xf32>
    %163 = vector.shape_cast %162 : vector<2xf32> to vector<2x1xf32>
    %cst_60 = arith.constant 2.000000e+00 : f32
    %164 = vector.broadcast %cst_60 : f32 to vector<2x1xf32>
    %165 = arith.mulf %163, %164 : vector<2x1xf32>
    %166 = arith.subf %159, %165 : vector<2x1xf32>
    %167 = arith.addf %135, %166 : vector<2x1xf32>
    %cst_61 = arith.constant dense<0.000000e+00> : vector<1xf32>
    %168 = vector.multi_reduction <add>, %167, %cst_61 [0] : vector<2x1xf32> to vector<1xf32>
    %169 = vector.shape_cast %168 : vector<1xf32> to vector<1x1xf32>
    %cst_62 = arith.constant 2.500000e-01 : f32
    %170 = vector.broadcast %cst_62 : f32 to vector<1x1xf32>
    %171 = arith.mulf %169, %170 : vector<1x1xf32>
    %c0_63 = arith.constant 0 : index
    %c0_64 = arith.constant 0 : index
    %172 = vector.load %arg9[%c0_63, %c0_64] : memref<1x1xf32, #tpu.memory_space<vmem>>, vector<1x1xf32>
    tpu.vector_store %arg9[%c0_63, %c0_64], %171 {strides = array<i32>} : memref<1x1xf32, #tpu.memory_space<vmem>>, vector<1x1xf32>,
    return
  }
}

</mosaic_0001>

<bundles_post_ra>
// kernel: simclrv2_forward.1
= control target key start
LH: loop header
LB: loop body
LE: loop exit
PB: predicated region body
PF: predicated region fallthrough
CT: control target
= control target key end

     0   :  { %v1364_v47 = vmov 1983009808   ;;  %v176_v49 = vlaneseq  ;;  %s1928_s0 = inlined_call_operand.vmem [shape: f32[2,1024], index: 0, kind: input, shape index: {}]   ;;  %s1929_s1 = inlined_call_operand.vmem [shape: f32[1024,32], index: 1, kind: input, shape index: {}]   ;;  %s1930_s2 = inlined_call_operand.vmem [shape: f32[1,32], index: 2, kind: input, shape index: {}]   ;;  %s1931_s3 = inlined_call_operand.vmem [shape: f32[32,32], index: 3, kind: input, shape index: {}]   ;;  %s1932_s4 = inlined_call_operand.vmem [shape: f32[2,32], index: 4, kind: input, shape index: {}]   ;;  %s1933_s5 = inlined_call_operand.vmem [shape: f32[32,32], index: 5, kind: input, shape index: {}]   ;;  %s1934_s6 = inlined_call_operand.vmem [shape: f32[2,32], index: 6, kind: input, shape index: {}]   ;;  %s1935_s7 = inlined_call_operand.vmem [shape: f32[32,16], index: 7, kind: input, shape index: {}]   ;;  %s1936_s8 = inlined_call_operand.vmem [shape: f32[2,16], index: 8, kind: input, shape index: {}]   ;;  %s1937_s9 = inlined_call_operand.hbm [shape: f32[1,1], index: 9, kind: output, shape index: {}]  }
   0x1   :  { %v51_v0 = vld [vmem:[%s1929_s1 + $0x80] sm:$0xff]  ;;  %v52_v1 = vld [vmem:[%s1929_s1 + $0x88] sm:$0xff]  ;;  %v53_v11 = vld [vmem:[%s1929_s1 + $0x90] sm:$0xff]  ;;  %v174_v48 = vunpack.c.l.s4 %v1364_v47 }
   0x2   :  { %v35_v2 = vld [vmem:[%s1929_s1] sm:$0xff]  ;;  %v1173_v3 = vpack.c.bf16 %v52_v1, %v51_v0  ;;  %v36_v4 = vld [vmem:[%s1929_s1 + $0x8] sm:$0xff]  ;;  %v54_v13 = vld [vmem:[%s1929_s1 + $0x98] sm:$0xff]  ;;  %v1546_v0 = vshrl.u32 %v176_v49, 7 }
   0x3   :  { %v83_v5 = vld [vmem:[%s1929_s1 + $0x180] sm:$0xff]  ;;  %v84_v6 = vld [vmem:[%s1929_s1 + $0x188] sm:$0xff]  ;;  %v1175_v7 = vpack.c.bf16 %v36_v4, %v35_v2  ;;  %v37_v14 = vld [vmem:[%s1929_s1 + $0x10] sm:$0xff]  ;;  %v1177_v16 = vpack.c.bf16 %v54_v13, %v53_v11  ;;  %v175_v63 = vunpack.c.0.s8 %v174_v48 }
   0x4   :  { %v1205_v8 = vpack.c.bf16 %v84_v6, %v83_v5  ;;  %v67_v9 = vld [vmem:[%s1929_s1 + $0x100] sm:$0xff]  ;;  %v68_v10 = vld [vmem:[%s1929_s1 + $0x108] sm:$0xff]  ;;  %1174 = vmatprep.subr.bf16.mxu0 %v1173_v3  ;;  %v38_v15 = vld [vmem:[%s1929_s1 + $0x18] sm:$0xff] }
   0x5   :  { %v1207_v12 = vpack.c.bf16 %v68_v10, %v67_v9  ;;  %1176 = vmatpush3.bf16.msra.mxu0 %v1175_v7  ;;  %v1179_v17 = vpack.c.bf16 %v38_v15, %v37_v14  ;;  %v85_v18 = vld [vmem:[%s1929_s1 + $0x190] sm:$0xff]  ;;  %v86_v19 = vld [vmem:[%s1929_s1 + $0x198] sm:$0xff]  ;;  %v55_v23 = vld [vmem:[%s1929_s1 + $0xa0] sm:$0xff]  ;;  %v1573_v13 = vsub.s32 %v175_v63, %v1546_v0 }
   0x6   :  { %1206 = vmatprep.subr.bf16.mxu1 %v1205_v8  ;;  %v69_v20 = vld [vmem:[%s1929_s1 + $0x110] sm:$0xff]  ;;  %v1209_v21 = vpack.c.bf16 %v86_v19, %v85_v18  ;;  %v70_v22 = vld [vmem:[%s1929_s1 + $0x118] sm:$0xff]  ;;  %v56_v24 = vld [vmem:[%s1929_s1 + $0xa8] sm:$0xff]  ;;  %1178 = vmatprep.subr.bf16.mxu0 %v1177_v16 }
   0x7   :  { %1208 = vmatpush3.bf16.msra.mxu1 %v1207_v12  ;;  %v1211_v25 = vpack.c.bf16 %v70_v22, %v69_v20  ;;  %v1181_v26 = vpack.c.bf16 %v56_v24, %v55_v23  ;;  %v39_v27 = vld [vmem:[%s1929_s1 + $0x20] sm:$0xff]  ;;  %v40_v28 = vld [vmem:[%s1929_s1 + $0x28] sm:$0xff]  ;;  %v57_v35 = vld [vmem:[%s1929_s1 + $0xb0] sm:$0xff] }
   0x8   :  { %v87_v29 = vld [vmem:[%s1929_s1 + $0x1a0] sm:$0xff]  ;;  %1210 = vmatprep.subr.bf16.mxu1 %v1209_v21  ;;  %v88_v30 = vld [vmem:[%s1929_s1 + $0x1a8] sm:$0xff]  ;;  %v1183_v33 = vpack.c.bf16 %v40_v28, %v39_v27  ;;  %v58_v36 = vld [vmem:[%s1929_s1 + $0xb8] sm:$0xff] }
   0x9   :  { %v71_v31 = vld [vmem:[%s1929_s1 + $0x120] sm:$0xff]  ;;  %v72_v32 = vld [vmem:[%s1929_s1 + $0x128] sm:$0xff]  ;;  %1180 = vmatpush3.bf16.msra.mxu0 %v1179_v17  ;;  %v1213_v34 = vpack.c.bf16 %v88_v30, %v87_v29  ;;  %v41_v37 = vld [vmem:[%s1929_s1 + $0x30] sm:$0xff]  ;;  %v1185_v39 = vpack.c.bf16 %v58_v36, %v57_v35 }
   0xa   :  { %1182 = vmatprep.subr.bf16.mxu0 %v1181_v26  ;;  %v1215_v38 = vpack.c.bf16 %v72_v32, %v71_v31  ;;  %v42_v40 = vld [vmem:[%s1929_s1 + $0x38] sm:$0xff]  ;;  %v89_v41 = vld [vmem:[%s1929_s1 + $0x1b0] sm:$0xff]  ;;  %v59_v46 = vld [vmem:[%s1929_s1 + $0xc0] sm:$0xff] }
   0xb   :  { %1212 = vmatpush3.bf16.msra.mxu1 %v1211_v25  ;;  %v90_v42 = vld [vmem:[%s1929_s1 + $0x1b8] sm:$0xff]  ;;  %v73_v44 = vld [vmem:[%s1929_s1 + $0x130] sm:$0xff]  ;;  %v60_v50 = vld [vmem:[%s1929_s1 + $0xc8] sm:$0xff]  ;;  %v1187_v51 = vpack.c.bf16 %v42_v40, %v41_v37 }
   0xc   :  { %1214 = vmatprep.subr.bf16.mxu1 %v1213_v34  ;;  %v1217_v43 = vpack.c.bf16 %v90_v42, %v89_v41  ;;  %v74_v45 = vld [vmem:[%s1929_s1 + $0x138] sm:$0xff]  ;;  %v91_v52 = vld [vmem:[%s1929_s1 + $0x1c0] sm:$0xff]  ;;  %v92_v53 = vld [vmem:[%s1929_s1 + $0x1c8] sm:$0xff]  ;;  %v1189_v55 = vpack.c.bf16 %v60_v50, %v59_v46 }
   0xd   :  { %1184 = vmatpush3.bf16.msra.mxu0 %v1183_v33  ;;  %v1219_v54 = vpack.c.bf16 %v74_v45, %v73_v44  ;;  %v43_v56 = vld [vmem:[%s1929_s1 + $0x40] sm:$0xff]  ;;  %v44_v57 = vld [vmem:[%s1929_s1 + $0x48] sm:$0xff]  ;;  %v1221_v59 = vpack.c.bf16 %v92_v53, %v91_v52  ;;  %v61_v61 = vld [vmem:[%s1929_s1 + $0xd0] sm:$0xff] }
   0xe   :  { %1186 = vmatprep.subr.bf16.mxu0 %v1185_v39  ;;  %v75_v58 = vld [vmem:[%s1929_s1 + $0x140] sm:$0xff]  ;;  %v76_v60 = vld [vmem:[%s1929_s1 + $0x148] sm:$0xff]  ;;  %v62_v62 = vld [vmem:[%s1929_s1 + $0xd8] sm:$0xff]  ;;  %v1191_v3 = vpack.c.bf16 %v44_v57, %v43_v56 }
   0xf   :  { %1216 = vmatpush3.bf16.msra.mxu1 %v1215_v38  ;;  %v93_v1 = vld [vmem:[%s1929_s1 + $0x1d0] sm:$0xff]  ;;  %v94_v2 = vld [vmem:[%s1929_s1 + $0x1d8] sm:$0xff]  ;;  %v1223_v4 = vpack.c.bf16 %v76_v60, %v75_v58  ;;  %v1193_v5 = vpack.c.bf16 %v62_v62, %v61_v61  ;;  %v63_v11 = vld [vmem:[%s1929_s1 + $0xe0] sm:$0xff] }
  0x10   :  { %1218 = vmatprep.subr.bf16.mxu1 %v1217_v43  ;;  %v45_v6 = vld [vmem:[%s1929_s1 + $0x50] sm:$0xff]  ;;  %v46_v7 = vld [vmem:[%s1929_s1 + $0x58] sm:$0xff]  ;;  %v1225_v9 = vpack.c.bf16 %v94_v2, %v93_v1  ;;  %v64_v12 = vld [vmem:[%s1929_s1 + $0xe8] sm:$0xff] }
  0x11   :  { %1188 = vmatpush3.bf16.msra.mxu0 %v1187_v51  ;;  %v77_v8 = vld [vmem:[%s1929_s1 + $0x150] sm:$0xff]  ;;  %v78_v10 = vld [vmem:[%s1929_s1 + $0x158] sm:$0xff]  ;;  %v95_v14 = vld [vmem:[%s1929_s1 + $0x1e0] sm:$0xff]  ;;  %v1195_v16 = vpack.c.bf16 %v46_v7, %v45_v6  ;;  %v1197_v19 = vpack.c.bf16 %v64_v12, %v63_v11 }
  0x12   :  { %1190 = vmatprep.subr.bf16.mxu0 %v1189_v55  ;;  %v96_v15 = vld [vmem:[%s1929_s1 + $0x1e8] sm:$0xff]  ;;  %v47_v17 = vld [vmem:[%s1929_s1 + $0x60] sm:$0xff]  ;;  %v1227_v18 = vpack.c.bf16 %v78_v10, %v77_v8  ;;  %v65_v25 = vld [vmem:[%s1929_s1 + $0xf0] sm:$0xff] }
  0x13   :  { %1220 = vmatpush3.bf16.msra.mxu1 %v1219_v54  ;;  %v48_v20 = vld [vmem:[%s1929_s1 + $0x68] sm:$0xff]  ;;  %v79_v21 = vld [vmem:[%s1929_s1 + $0x160] sm:$0xff]  ;;  %v1229_v23 = vpack.c.bf16 %v96_v15, %v95_v14  ;;  %v66_v26 = vld [vmem:[%s1929_s1 + $0xf8] sm:$0xff] }
  0x14   :  { %1222 = vmatprep.subr.bf16.mxu1 %v1221_v59  ;;  %v33_v22 = vld [vmem:[%s1928_s0] sm:$0xff]  ;;  %v80_v24 = vld [vmem:[%s1929_s1 + $0x168] sm:$0xff]  ;;  %v97_v29 = vld [vmem:[%s1929_s1 + $0x1f0] sm:$0xff]  ;;  %v1199_v31 = vpack.c.bf16 %v48_v20, %v47_v17  ;;  %v1201_v35 = vpack.c.bf16 %v66_v26, %v65_v25 }
  0x15   :  { %1192 = vmatpush3.bf16.msra.mxu0 %v1191_v3  ;;  %v179_v27 = vrot.slane %v33_v22, %v1573_v13  ;;  %v172_v28 = vcombine.high %v33_v22, %v33_v22  ;;  %v98_v30 = vld [vmem:[%s1929_s1 + $0x1f8] sm:$0xff]  ;;  %v1231_v34 = vpack.c.bf16 %v80_v24, %v79_v21  ;;  %v49_v36 = vld [vmem:[%s1929_s1 + $0x70] sm:$0xff]  ;;  %v115_v41 = vld [vmem:[%s1929_s1 + $0x280] sm:$0xff] }
  0x16   :  { %1194 = vmatprep.subr.bf16.mxu0 %v1193_v5  ;;  %v50_v37 = vld [vmem:[%s1929_s1 + $0x78] sm:$0xff]  ;;  %v81_v38 = vld [vmem:[%s1929_s1 + $0x170] sm:$0xff]  ;;  %v1233_v39 = vpack.c.bf16 %v98_v30, %v97_v29  ;;  %v116_v42 = vld [vmem:[%s1929_s1 + $0x288] sm:$0xff] }
  0x17   :  { %1224 = vmatpush3.bf16.msra.mxu1 %v1223_v4  ;;  %v187_v32 = vcombine.high %v179_v27, %v179_v27  ;;  %v186_v33 = vrot.slane %v172_v28, %v1573_v13  ;;  %v82_v40 = vld [vmem:[%s1929_s1 + $0x178] sm:$0xff]  ;;  %v147_v44 = vld [vmem:[%s1929_s1 + $0x380] sm:$0xff]  ;;  %v148_v45 = vld [vmem:[%s1929_s1 + $0x388] sm:$0xff]  ;;  %v1203_v46 = vpack.c.bf16 %v50_v37, %v49_v36  ;;  %v1237_v48 = vpack.c.bf16 %v116_v42, %v115_v41 }
  0x18   :  { %1226 = vmatprep.subr.bf16.mxu1 %v1225_v9  ;;  %v1235_v47 = vpack.c.bf16 %v82_v40, %v81_v38  ;;  %v99_v50 = vld [vmem:[%s1929_s1 + $0x200] sm:$0xff]  ;;  %v100_v51 = vld [vmem:[%s1929_s1 + $0x208] sm:$0xff]  ;;  %v1269_v53 = vpack.c.bf16 %v148_v45, %v147_v44  ;;  %v117_v55 = vld [vmem:[%s1929_s1 + $0x290] sm:$0xff] }
  0x19   :  { %1196 = vmatpush3.bf16.msra.mxu0 %v1195_v16  ;;  %278 = vmatprep.mubr.f32.mxu0 %v187_v32  ;;  %v188_v43 = vcombine.high %v186_v33, %v186_v33  ;;  %v131_v52 = vld [vmem:[%s1929_s1 + $0x300] sm:$0xff]  ;;  %v132_v54 = vld [vmem:[%s1929_s1 + $0x308] sm:$0xff]  ;;  %v118_v56 = vld [vmem:[%s1929_s1 + $0x298] sm:$0xff]  ;;  %v1239_v59 = vpack.c.bf16 %v100_v51, %v99_v50 }
  0x1a   :  { %1198 = vmatprep.subr.bf16.mxu0 %v1197_v19  ;;  %v149_v57 = vld [vmem:[%s1929_s1 + $0x390] sm:$0xff]  ;;  %v150_v58 = vld [vmem:[%s1929_s1 + $0x398] sm:$0xff]  ;;  %v1271_v60 = vpack.c.bf16 %v132_v54, %v131_v52  ;;  %v1241_v61 = vpack.c.bf16 %v118_v56, %v117_v55  ;;  %v119_v4 = vld [vmem:[%s1929_s1 + $0x2a0] sm:$0xff] }
  0x1b   :  { %1228 = vmatpush3.bf16.msra.mxu1 %v1227_v18  ;;  %348 = vmatprep.mubr.f32.mxu1 %v188_v43  ;;  %v101_v62 = vld [vmem:[%s1929_s1 + $0x210] sm:$0xff]  ;;  %v102_v63 = vld [vmem:[%s1929_s1 + $0x218] sm:$0xff]  ;;  %v1273_v2 = vpack.c.bf16 %v150_v58, %v149_v57  ;;  %v120_v5 = vld [vmem:[%s1929_s1 + $0x2a8] sm:$0xff] }
  0x1c   :  { %1230 = vmatprep.subr.bf16.mxu1 %v1229_v23  ;;  %v133_v1 = vld [vmem:[%s1929_s1 + $0x310] sm:$0xff]  ;;  %v134_v3 = vld [vmem:[%s1929_s1 + $0x318] sm:$0xff]  ;;  %v151_v6 = vld [vmem:[%s1929_s1 + $0x3a0] sm:$0xff]  ;;  %v1243_v8 = vpack.c.bf16 %v102_v63, %v101_v62  ;;  %v1245_v10 = vpack.c.bf16 %v120_v5, %v119_v4 }
  0x1d   :  { %1200 = vmatpush3.bf16.msra.mxu0 %v1199_v31  ;;  %v152_v7 = vld [vmem:[%s1929_s1 + $0x3a8] sm:$0xff]  ;;  %v1275_v9 = vpack.c.bf16 %v134_v3, %v133_v1  ;;  %v103_v11 = vld [vmem:[%s1929_s1 + $0x220] sm:$0xff]  ;;  %v121_v17 = vld [vmem:[%s1929_s1 + $0x2b0] sm:$0xff] }
  0x1e   :  { %1202 = vmatprep.subr.bf16.mxu0 %v1201_v35  ;;  %v104_v12 = vld [vmem:[%s1929_s1 + $0x228] sm:$0xff]  ;;  %v135_v14 = vld [vmem:[%s1929_s1 + $0x320] sm:$0xff]  ;;  %v1277_v15 = vpack.c.bf16 %v152_v7, %v151_v6  ;;  %v122_v18 = vld [vmem:[%s1929_s1 + $0x2b8] sm:$0xff] }
  0x1f   :  { %1232 = vmatpush3.bf16.msra.mxu1 %v1231_v34  ;;  %v136_v16 = vld [vmem:[%s1929_s1 + $0x328] sm:$0xff]  ;;  %v153_v19 = vld [vmem:[%s1929_s1 + $0x3b0] sm:$0xff]  ;;  %v154_v20 = vld [vmem:[%s1929_s1 + $0x3b8] sm:$0xff]  ;;  %v1247_v21 = vpack.c.bf16 %v104_v12, %v103_v11  ;;  %v1249_v24 = vpack.c.bf16 %v122_v18, %v121_v17 }
  0x20   :  { %1234 = vmatprep.subr.bf16.mxu1 %v1233_v39  ;;  %v105_v22 = vld [vmem:[%s1929_s1 + $0x230] sm:$0xff]  ;;  %v1279_v23 = vpack.c.bf16 %v136_v16, %v135_v14  ;;  %v106_v25 = vld [vmem:[%s1929_s1 + $0x238] sm:$0xff]  ;;  %v1281_v28 = vpack.c.bf16 %v154_v20, %v153_v19  ;;  %v123_v29 = vld [vmem:[%s1929_s1 + $0x2c0] sm:$0xff] }
  0x21   :  { %1204 = vmatpush3.bf16.msra.mxu0 %v1203_v46  ;;  %v137_v26 = vld [vmem:[%s1929_s1 + $0x330] sm:$0xff]  ;;  %v124_v30 = vld [vmem:[%s1929_s1 + $0x2c8] sm:$0xff]  ;;  %v155_v31 = vld [vmem:[%s1929_s1 + $0x3c0] sm:$0xff] }
  0x22   :  { %1238 = vmatprep.subr.bf16.mxu0 %v1237_v48  ;;  %v156_v32 = vld [vmem:[%s1929_s1 + $0x3c8] sm:$0xff] }
  0x23   :  { %1236 = vmatpush3.bf16.msra.mxu1 %v1235_v47 }
  0x24   :  { %1270 = vmatprep.subr.bf16.mxu1 %v1269_v53  ;;  %279 = vmatmul.mubr.f32.vlgmr.msra.gmra.mrb[0].mxu0 %v179_v27  ;;  %v138_v27 = vld [vmem:[%s1929_s1 + $0x338] sm:$0xff] }
  0x25   :  { %1240 = vmatpush3.bf16.msra.mxu0 %v1239_v59 }
  0x26   :  { %349 = vmatmul.mubr.f32.vlgmr.msra.gmra.mrb[0].mxu1 %v186_v33  ;;  %1242 = vmatprep.subr.bf16.mxu0 %v1241_v61  ;;  %v34_v33 = vld [vmem:[%s1928_s0 + $0x8] sm:$0xff] }
  0x27   :  { %1272 = vmatpush3.bf16.msra.mxu1 %v1271_v60 }
  0x28   :  { %1274 = vmatprep.subr.bf16.mxu1 %v1273_v2 }
  0x29   :  { %1244 = vmatpush3.bf16.msra.mxu0 %v1243_v8 }
  0x2a   :  { %1246 = vmatprep.subr.bf16.mxu0 %v1245_v10 }
  0x2b   :  { %1276 = vmatpush3.bf16.msra.mxu1 %v1275_v9 }
  0x2c   :  { %1278 = vmatprep.subr.bf16.mxu1 %v1277_v15 }
  0x2d   :  { %14 = vsyncpa [#allocation3], 0  ;;  %1248 = vmatpush3.bf16.msra.mxu0 %v1247_v21  ;;  %v1251_v34 = vpack.c.bf16 %v106_v25, %v105_v22  ;;  %v1734_v35 = vrot.slane %v34_v33, %v1573_v13  ;;  %v189_v36 = vcombine.high %v34_v33, %v34_v33  ;;  %v1283_v37 = vpack.c.bf16 %v138_v27, %v137_v26  ;;  %v107_v39 = vld [vmem:[%s1929_s1 + $0x240] sm:$0xff]  ;;  %v108_v40 = vld [vmem:[%s1929_s1 + $0x248] sm:$0xff] }
  0x2e   :  { %1250 = vmatprep.subr.bf16.mxu0 %v1249_v24  ;;  %v1253_v38 = vpack.c.bf16 %v124_v30, %v123_v29  ;;  %v139_v41 = vld [vmem:[%s1929_s1 + $0x340] sm:$0xff]  ;;  %v1285_v42 = vpack.c.bf16 %v156_v32, %v155_v31  ;;  %v140_v43 = vld [vmem:[%s1929_s1 + $0x348] sm:$0xff]  ;;  %v125_v44 = vld [vmem:[%s1929_s1 + $0x2d0] sm:$0xff]  ;;  %v1255_v51 = vpack.c.bf16 %v108_v40, %v107_v39  ;;  %v1365_v26 = vmov 0.0|0.0  }
  0x2f   :  { %1280 = vmatpush3.bf16.msra.mxu1 %v1279_v23  ;;  %v126_v45 = vld [vmem:[%s1929_s1 + $0x2d8] sm:$0xff]  ;;  %v204_v46 = vcombine.high %v1734_v35, %v1734_v35  ;;  %v203_v47 = vrot.slane %v189_v36, %v1573_v13  ;;  %v157_v48 = vld [vmem:[%s1929_s1 + $0x3d0] sm:$0xff]  ;;  %v1287_v53 = vpack.c.bf16 %v140_v43, %v139_v41  ;;  %v127_v59 = vld [vmem:[%s1929_s1 + $0x2e0] sm:$0xff]  ;;  %vm1366_vm0 = vmmov 0  }
  0x30   :  { %1282 = vmatprep.subr.bf16.mxu1 %v1281_v28  ;;  %v158_v50 = vld [vmem:[%s1929_s1 + $0x3d8] sm:$0xff]  ;;  %v1257_v54 = vpack.c.bf16 %v126_v45, %v125_v44  ;;  %v109_v13 = vld [vmem:[%s1929_s1 + $0x250] sm:$0xff]  ;;  %v128_v60 = vld [vmem:[%s1929_s1 + $0x2e8] sm:$0xff]  ;;  %v1367_v30 = vmov 0.0   ;;  %vm499_vm1 = vcmask 261120   ;;  %vm574_vm2 = vcmask 254976  }
  0x31   :  { %1252 = vmatpush3.bf16.msra.mxu0 %v1251_v34  ;;  %418 = vmatprep.mubr.f32.mxu0 %v204_v46  ;;  %v205_v52 = vcombine.high %v203_v47, %v203_v47  ;;  %v110_v55 = vld [vmem:[%s1929_s1 + $0x258] sm:$0xff]  ;;  %v141_v56 = vld [vmem:[%s1929_s1 + $0x350] sm:$0xff]  ;;  %v1289_v57 = vpack.c.bf16 %v158_v50, %v157_v48  ;;  %v159_v61 = vld [vmem:[%s1929_s1 + $0x3e0] sm:$0xff]  ;;  %v1261_v2 = vpack.c.bf16 %v128_v60, %v127_v59  ;;  %vm796_vm3 = vcmask 123904  }
  0x32   :  { %1254 = vmatprep.subr.bf16.mxu0 %v1253_v38  ;;  %v142_v58 = vld [vmem:[%s1929_s1 + $0x358] sm:$0xff]  ;;  %v160_v62 = vld [vmem:[%s1929_s1 + $0x3e8] sm:$0xff]  ;;  %v1259_v63 = vpack.c.bf16 %v110_v55, %v109_v13  ;;  %v111_v3 = vld [vmem:[%s1929_s1 + $0x260] sm:$0xff]  ;;  %vm835_vm4 = vcmask 130048   ;;  %vm916_vm6 = vcmask 9216   ;;  %vm947_vm7 = vcmask 1041408  }
  0x33   :  { %1284 = vmatpush3.bf16.msra.mxu1 %v1283_v37  ;;  %488 = vmatprep.mubr.f32.mxu1 %v205_v52  ;;  %v1291_v1 = vpack.c.bf16 %v142_v58, %v141_v56  ;;  %v112_v4 = vld [vmem:[%s1929_s1 + $0x268] sm:$0xff]  ;;  %v143_v5 = vld [vmem:[%s1929_s1 + $0x360] sm:$0xff]  ;;  %v1293_v6 = vpack.c.bf16 %v160_v62, %v159_v61  ;;  %v129_v8 = vld [vmem:[%s1929_s1 + $0x2f0] sm:$0xff]  ;;  %vm956_vm8 = vcmask 0  }
  0x34   :  { %1286 = vmatprep.subr.bf16.mxu1 %v1285_v42  ;;  %v144_v7 = vld [vmem:[%s1929_s1 + $0x368] sm:$0xff]  ;;  %v130_v9 = vld [vmem:[%s1929_s1 + $0x2f8] sm:$0xff]  ;;  %v161_v10 = vld [vmem:[%s1929_s1 + $0x3f0] sm:$0xff]  ;;  %v1263_v12 = vpack.c.bf16 %v112_v4, %v111_v3 }
  0x35   :  { %1256 = vmatpush3.bf16.msra.mxu0 %v1255_v51  ;;  %v162_v11 = vld [vmem:[%s1929_s1 + $0x3f8] sm:$0xff]  ;;  %v1295_v14 = vpack.c.bf16 %v144_v7, %v143_v5  ;;  %v1265_v15 = vpack.c.bf16 %v130_v9, %v129_v8  ;;  %v113_v16 = vld [vmem:[%s1929_s1 + $0x270] sm:$0xff]  ;;  %v495_v23 = vld [vmem:[%s1931_s3] sm:$0xff] }
  0x36   :  { %1258 = vmatprep.subr.bf16.mxu0 %v1257_v54  ;;  %v114_v17 = vld [vmem:[%s1929_s1 + $0x278] sm:$0xff]  ;;  %v1297_v18 = vpack.c.bf16 %v162_v11, %v161_v10  ;;  %v145_v19 = vld [vmem:[%s1929_s1 + $0x370] sm:$0xff]  ;;  %v496_v24 = vld [vmem:[%s1931_s3 + $0x8] sm:$0xff] }
  0x37   :  { %1288 = vmatpush3.bf16.msra.mxu1 %v1287_v53  ;;  %v146_v20 = vld [vmem:[%s1929_s1 + $0x378] sm:$0xff]  ;;  %v1267_v21 = vpack.c.bf16 %v114_v17, %v113_v16  ;;  %v1302_v25 = vpack.c.bf16 %v496_v24, %v495_v23  ;;  %v497_v27 = vld [vmem:[%s1931_s3 + $0x10] sm:$0xff]  ;;  %v972_v32 = vld [vmem:[%s1930_s2] ss:$0 sm:$0xff]  ;;  %v1873_v16 = vsub.s32 1, %v1546_v0 }
  0x38   :  { %1290 = vmatprep.subr.bf16.mxu1 %v1289_v57  ;;  %v1299_v22 = vpack.c.bf16 %v146_v20, %v145_v19  ;;  %v498_v28 = vld [vmem:[%s1931_s3 + $0x18] sm:$0xff]  ;;  %v608_v50 = vld [vmem:[%s1933_s5] sm:$0xff]  ;;  %v609_v51 = vld [vmem:[%s1933_s5 + $0x8] sm:$0xff] }
  0x39   :  { %1260 = vmatpush3.bf16.msra.mxu0 %v1259_v63  ;;  %v1305_v29 = vpack.c.bf16 %v498_v28, %v497_v27  ;;  %v1308_v52 = vpack.c.bf16 %v609_v51, %v608_v50  ;;  %v610_v53 = vld [vmem:[%s1933_s5 + $0x10] sm:$0xff]  ;;  %v611_v54 = vld [vmem:[%s1933_s5 + $0x18] sm:$0xff]  ;;  %v718_v24 = vld [vmem:[%s1935_s7] sm:$0xff] }
  0x3a   :  { %1262 = vmatprep.subr.bf16.mxu0 %v1261_v2  ;;  %v1311_v13 = vpack.c.bf16 %v611_v54, %v610_v53  ;;  %v720_v28 = vld [vmem:[%s1935_s7 + $0x10] sm:$0xff] }
  0x3b   :  { %1292 = vmatpush3.bf16.msra.mxu1 %v1291_v1 }
  0x3c   :  { %1294 = vmatprep.subr.bf16.mxu1 %v1293_v6 }
  0x3d   :  { %1264 = vmatpush3.bf16.msra.mxu0 %v1263_v12 }
  0x3e   :  { %1266 = vmatprep.subr.bf16.mxu0 %v1265_v15  ;;  %v573_v15 = vld [vmem:[%s1932_s4] sm:$0x3] }
  0x3f   :  { %1296 = vmatpush3.bf16.msra.mxu1 %v1295_v14  ;;  %v1867_v14 = vsub.s32 0, %v1546_v0  ;;  %v605_v20 = vrot.slane %v573_v15, %v1873_v16 }
  0x40   :  { %1298 = vmatprep.subr.bf16.mxu1 %v1297_v18 }
  0x41   :  { %1268 = vmatpush3.bf16.msra.mxu0 %v1267_v21  ;;  %v600_v17 = vrot.slane %v573_v15, %v1867_v14 }
  0x42   :  { %1301 = vmatprep.subr.bf16.mxu0 %v1365_v26 }
  0x43   :  { %1300 = vmatpush3.bf16.msra.mxu1 %v1299_v22 }
  0x44   :  { %419 = vmatmul.mubr.f32.vlgmr.msra.gmra.mrb[2].mxu0 %v1734_v35  ;;  %1307 = vmatprep.subr.bf16.mxu1 %v1365_v26 }
  0x45   :  { %1303 = vmatpush3.bf16.msra.mxu0 %v1302_v25  ;;  %1143 = vmatprep.mubr.msk.f32.mxu0 %vm1366_vm0, %v1367_v30  ;;  %v719_v25 = vld [vmem:[%s1935_s7 + $0x8] sm:$0xff] }
  0x46   :  { %489 = vmatmul.mubr.f32.vlgmr.msra.gmra.mrb[2].mxu1 %v203_v47  ;;  %1304 = vmatprep.subr.bf16.mxu0 %v1365_v26  ;;  %v1314_v27 = vpack.c.bf16 %v719_v25, %v718_v24 }
  0x47   :  { %1154 = vmatprep.mubr.msk.f32.mxu1 %vm1366_vm0, %v1367_v30  ;;  %1309 = vmatpush3.bf16.msra.mxu1 %v1308_v52  ;;  %v685_v52 = vld [vmem:[%s1934_s6] sm:$0x3] }
  0x48   :  { %1310 = vmatprep.subr.bf16.mxu1 %v1365_v26  ;;  %v710_v53 = vrot.slane %v685_v52, %v1867_v14 }
  0x49   :  { %1306 = vmatpush3.bf16.msra.mxu0 %v1305_v29  ;;  %v721_v29 = vld [vmem:[%s1935_s7 + $0x18] sm:$0xff] }
  0x4a   :  { %1313 = vmatprep.subr.bf16.mxu0 %v1365_v26 }
  0x4b   :  { %1312 = vmatpush3.bf16.msra.mxu1 %v1311_v13 }
  0x4c   :  { %1168 = vmatprep.subr.mxu1 %v1367_v30 }
  0xf7   :  { %v1010_v31 = vpop.f32.mrb[0].mxu0 }
  0xf8   :  { %v1011_v33 = vpop.f32.mrb[1].mxu0 }
  0xf9   :  { %v1045_v34 = vpop.f32.mrb[0].mxu1  ;;  %v1012_v35 = vadd.f32 %v1011_v33, %v1010_v31 }
  0xfa   :  { %v1046_v36 = vpop.f32.mrb[1].mxu1 }
  0xfb   :  { %v1047_v37 = vadd.f32 %v1046_v36, %v1045_v34  ;;  %v281_v38 = vadd.f32 %v1012_v35, %v972_v32 }
  0xfd   :  { %v351_v39 = vadd.f32 %v1047_v37, %v281_v38 }
 0x117   :  { %v1080_v40 = vpop.f32.mrb[2].mxu0 }
 0x118   :  { %v1081_v41 = vpop.f32.mrb[3].mxu0 }
 0x119   :  { %v1115_v42 = vpop.f32.mrb[2].mxu1  ;;  %v1082_v43 = vadd.f32 %v1081_v41, %v1080_v40 }
 0x11a   :  { %v1116_v44 = vpop.f32.mrb[3].mxu1 }
 0x11b   :  { %v1117_v45 = vadd.f32 %v1116_v44, %v1115_v42  ;;  %v421_v46 = vadd.f32 %v1082_v43, %v351_v39 }
 0x11d   :  { %v491_v47 = vadd.f32 %v1117_v45, %v421_v46 }
 0x11f   :  { %v494_v48 = vmax.f32 %v491_v47, 0.0 }
 0x121   :  { %1144 = vmatmul.mubr.msk.f32.vlgmr.msra.gmra.mrb[4].mxu0 %vm499_vm1, %v494_v48 }
 0x122   :  { %1165 = vmatprep.mubr.msk.f32.mxu0 %vm1366_vm0, %v1367_v30  ;;  %1315 = vmatpush3.bf16.msra.mxu0 %v1314_v27 }
 0x123   :  { %1316 = vmatprep.subr.bf16.mxu0 %v1365_v26 }
 0x1f4   :  { %v569_v55 = vpop.f32.mrb[4].mxu0 }
 0x1f5   :  { %v575_v56 = vsel %vm574_vm2, %v569_v55, 0.0  ;;  %v1145_v57 = vpop.f32.mrb[5].mxu0 }
 0x1f6   :  { %v576_v58 = vrot.slane %v575_v56, 4 }
 0x1f8   :  { %v577_v59 = vadd.f32 %v576_v58, %v575_v56 }
 0x1fa   :  { %v578_v60 = vrot.slane %v577_v59, 2 }
 0x1fc   :  { %v579_v61 = vadd.f32 %v578_v60, %v577_v59 }
 0x1fe   :  { %v580_v62 = vrot.slane %v579_v61, 1 }
 0x200   :  { %v581_v63 = vadd.f32 %v580_v62, %v579_v61 }
 0x202   :  { %v583_v1 = vmul.f32 0.5, %v581_v63 }
 0x204   :  { %v584_v2 = vsub.f32 %v569_v55, %v583_v1  ;;  %v715_v55 = vrot.slane %v685_v52, %v1873_v16 }
 0x206   :  { %v585_v3 = vmul.f32 %v584_v2, %v584_v2 }
 0x208   :  { %v586_v4 = vsel %vm574_vm2, %v585_v3, 0.0 }
 0x209   :  { %v587_v5 = vrot.slane %v586_v4, 4 }
 0x20b   :  { %v588_v6 = vadd.f32 %v587_v5, %v586_v4 }
 0x20d   :  { %v589_v7 = vrot.slane %v588_v6, 2 }
 0x20f   :  { %v590_v8 = vadd.f32 %v589_v7, %v588_v6 }
 0x211   :  { %v591_v9 = vrot.slane %v590_v8, 1 }
 0x213   :  { %v592_v10 = vadd.f32 %v591_v9, %v590_v8 }
 0x215   :  { %v593_v11 = vmul.f32 0.5, %v592_v10 }
 0x217   :  { %v594_v12 = vadd.f32 1e-05, %v593_v11 }
 0x219   :  { %1326 = vrsqrt.f32 %v594_v12 }
 0x223   :  { %v1327_v18 = vpop.eup %1326 }
 0x224   :  { %v596_v19 = vmul.f32 %v1327_v18, %v584_v2 }
 0x226   :  { %v601_v21 = vmul.f32 %v600_v17, %v596_v19 }
 0x228   :  { %v606_v22 = vadd.f32 %v605_v20, %v601_v21  ;;  %v795_v20 = vld [vmem:[%s1936_s8] sm:$0x3]  ;;  %s1368_s8 = smov [#allocation2]  }
 0x229   :  { %v821_v21 = vrot.slane %v795_v20, %v1867_v14  ;;  %v826_v24 = vrot.slane %v795_v20, %v1873_v16  ;;  %v912_v14 = vand.u32 127, %v176_v49  ;;  %s964_s17 = sshll.u32 %s1368_s8, 4  ;;  %s965_s17 = int_to_ptr.vmem [resolvable:$true] %s964_s17 }
 0x22a   :  { %v607_v23 = vmax.f32 %v606_v22, 0.0  ;;  %s1340_s1 = scalar_lea.vmem %s965_s17, 16  ;;  %s1344_s18 = scalar_lea.vmem %s965_s17, 32 }
 0x22b   :  { %vm913_vm5 = vcmp.eq.s32.totalorder %v1546_v0, %v912_v14  ;;  %p1341_p0 = scmp.ne.s32.totalorder %s965_s17, %s1340_s1  ;;  %p1345_p1 = scmp.lt.s32.totalorder %s965_s17, %s965_s17 }
 0x22c   :  { %1155 = vmatmul.mubr.msk.f32.vlgmr.msra.gmra.mrb[4].mxu1 %vm499_vm1, %v607_v23  ;;  %p1346_p2 = scmp.lt.s32.totalorder %s1344_s18, %s1340_s1 }
 0x22d   :  { %1170 = vmatprep.mubr.msk.f32.mxu1 %vm1366_vm0, %v1367_v30  ;;  %v1317_v30 = vpack.c.bf16 %v721_v29, %v720_v28 }
 0x22e   :  { %p1347_p3 = por %p1346_p2, %p1345_p1 }
 0x22f   :  { %1318 = vmatpush3.bf16.msra.mxu0 %v1317_v30 }
 0x230   :  { %p1348_p4 = pnand %p1347_p3, %p1341_p0 }
 0x2ff   :  { %v681_v31 = vpop.f32.mrb[4].mxu1 }
 0x300   :  { %v686_v32 = vsel %vm574_vm2, %v681_v31, 0.0  ;;  %v1156_v33 = vpop.f32.mrb[5].mxu1 }
 0x301   :  { %v687_v34 = vrot.slane %v686_v32, 4 }
 0x303   :  { %v688_v35 = vadd.f32 %v687_v34, %v686_v32 }
 0x305   :  { %v689_v36 = vrot.slane %v688_v35, 2 }
 0x307   :  { %v690_v37 = vadd.f32 %v689_v36, %v688_v35 }
 0x309   :  { %v691_v38 = vrot.slane %v690_v37, 1 }
 0x30b   :  { %v692_v26 = vadd.f32 %v691_v38, %v690_v37 }
 0x30d   :  { %v693_v39 = vmul.f32 0.5, %v692_v26 }
 0x30f   :  { %v694_v40 = vsub.f32 %v681_v31, %v693_v39 }
 0x311   :  { %v695_v41 = vmul.f32 %v694_v40, %v694_v40 }
 0x313   :  { %v696_v42 = vsel %vm574_vm2, %v695_v41, 0.0 }
 0x314   :  { %v697_v43 = vrot.slane %v696_v42, 4 }
 0x316   :  { %v698_v44 = vadd.f32 %v697_v43, %v696_v42 }
 0x318   :  { %v699_v45 = vrot.slane %v698_v44, 2 }
 0x31a   :  { %v700_v46 = vadd.f32 %v699_v45, %v698_v44 }
 0x31c   :  { %v701_v47 = vrot.slane %v700_v46, 1 }
 0x31e   :  { %v702_v48 = vadd.f32 %v701_v47, %v700_v46 }
 0x320   :  { %v703_v50 = vmul.f32 0.5, %v702_v48 }
 0x322   :  { %v704_v51 = vadd.f32 1e-05, %v703_v50 }
 0x324   :  { %1328 = vrsqrt.f32 %v704_v51 }
 0x32e   :  { %v1329_v54 = vpop.eup %1328 }
 0x32f   :  { %v706_v13 = vmul.f32 %v1329_v54, %v694_v40 }
 0x331   :  { %v711_v56 = vmul.f32 %v710_v53, %v706_v13 }
 0x333   :  { %v716_v57 = vadd.f32 %v715_v55, %v711_v56 }
 0x335   :  { %v717_v58 = vmax.f32 %v716_v57, 0.0 }
 0x337   :  { %1166 = vmatmul.mubr.msk.f32.vlgmr.msra.gmra.mrb[6].mxu0 %vm499_vm1, %v717_v58 }
 0x40a   :  { %v791_v59 = vpop.f32.mrb[6].mxu0 }
 0x40b   :  { %v797_v60 = vsel %vm796_vm3, %v791_v59, 0.0  ;;  %v1167_v61 = vpop.f32.mrb[7].mxu0 }
 0x40c   :  { %v798_v62 = vrot.slane %v797_v60, 4 }
 0x40e   :  { %v799_v63 = vadd.f32 %v798_v62, %v797_v60 }
 0x410   :  { %v800_v1 = vrot.slane %v799_v63, 2 }
 0x412   :  { %v801_v2 = vadd.f32 %v800_v1, %v799_v63 }
 0x414   :  { %v802_v3 = vrot.slane %v801_v2, 1 }
 0x416   :  { %v803_v4 = vadd.f32 %v802_v3, %v801_v2 }
 0x418   :  { %v804_v5 = vmul.f32 0.5, %v803_v4 }
 0x41a   :  { %v805_v6 = vsub.f32 %v791_v59, %v804_v5 }
 0x41c   :  { %v806_v7 = vmul.f32 %v805_v6, %v805_v6 }
 0x41e   :  { %v807_v8 = vsel %vm796_vm3, %v806_v7, 0.0 }
 0x41f   :  { %v808_v9 = vrot.slane %v807_v8, 4 }
 0x421   :  { %v809_v10 = vadd.f32 %v808_v9, %v807_v8 }
 0x423   :  { %v810_v11 = vrot.slane %v809_v10, 2 }
 0x425   :  { %v811_v12 = vadd.f32 %v810_v11, %v809_v10 }
 0x427   :  { %v812_v15 = vrot.slane %v811_v12, 1 }
 0x429   :  { %v813_v17 = vadd.f32 %v812_v15, %v811_v12 }
 0x42b   :  { %v814_v18 = vmul.f32 0.5, %v813_v17 }
 0x42d   :  { %v815_v19 = vadd.f32 1e-05, %v814_v18 }
 0x42f   :  { %1330 = vrsqrt.f32 %v815_v19 }
 0x439   :  { %v1331_v22 = vpop.eup %1330 }
 0x43a   :  { %v817_v23 = vmul.f32 %v1331_v22, %v805_v6 }
 0x43c   :  { %v822_v25 = vmul.f32 %v821_v21, %v817_v23 }
 0x43e   :  { %v827_v27 = vadd.f32 %v826_v24, %v822_v25 }
 0x440   :  { %v828_v28 = vmul.f32 %v827_v27, %v827_v27 }
 0x442   :  { %v829_v29 = vsel %vm796_vm3, %v828_v28, 0.0 }
 0x443   :  { %830 = vadd.xlane.f32.xlu0 %v829_v29 }
 0x4d0   :  { %v831_v30 = vpop.xlane.xlu0 %830 }
 0x4d1   :  { %v832_v31 = vmax.f32 %v831_v30, 1e-24 }
 0x4d3   :  { %1332 = vrsqrt.f32 %v832_v31 }
 0x4dd   :  { %v1333_v32 = vpop.eup %1332 }
 0x4de   :  { %v834_v33 = vmul.f32 %v1333_v32, %v827_v27 }
 0x4e0   :  { %1169 = vmatpush3.xpose.msk.msra.mxu1 %vm835_vm4, %v834_v33 }
 0x4e3   :  { %1171 = vmatmul.mubr.msk.f32.vlgmr.msra.gmra.mrb[6].mxu1 %vm835_vm4, %v834_v33 }
 0x5b6   :  { %v905_v34 = vpop.f32.mrb[6].mxu1 }
 0x5b7   :  { %v914_v16 = vmul.f32 2.0, %v905_v34  ;;  %v1172_v35 = vpop.f32.mrb[7].mxu1  ;;  %v940_v36 = vsel %vm913_vm5, %v905_v34, 0.0 }
 0x5b8   :  { %v941_v48 = vsel %vm916_vm6, %v940_v36, 0.0 }
 0x5b9   :  { %v920_v37 = vsel %vm916_vm6, %v914_v16, -inf  ;;  %v915_v38 = vsel %vm913_vm5, -1e+30, %v914_v16 }
 0x5ba   :  { %921 = vmax.xlane.f32.xlu1 %v920_v37  ;;  %v917_v26 = vsel %vm916_vm6, %v915_v38, -inf }
 0x5bb   :  { %918 = vmax.xlane.f32.xlu0 %v917_v26 }
 0x647   :  { %v922_v39 = vpop.xlane.xlu1 %921 }
 0x648   :  { %v919_v40 = vpop.xlane.xlu0 %918 }
 0x649   :  { %v923_v41 = vmax.f32 %v919_v40, %v922_v39 }
 0x64b   :  { %v924_v42 = vsub.f32 %v915_v38, %v923_v41  ;;  %v930_v43 = vsub.f32 %v914_v16, %v923_v41 }
 0x64d   :  { %v925_v49 = vmul.f32 1.442695, %v924_v42  ;;  %v931_v44 = vmul.f32 1.442695, %v930_v43 }
 0x64f   :  { %1334 = vpow2.f32 %v925_v49 }
 0x650   :  { %1336 = vpow2.f32 %v931_v44 }
 0x659   :  { %v1335_v0 = vpop.eup %1334 }
 0x65a   :  { %v1337_v45 = vpop.eup %1336  ;;  %v927_v46 = vsel %vm916_vm6, %v1335_v0, 0.0 }
 0x65b   :  { %v933_v47 = vsel %vm916_vm6, %v1337_v45, 0.0  ;;  %928 = vadd.xlane.f32.xlu1 %v927_v46 }
 0x65c   :  { %934 = vadd.xlane.f32.xlu0 %v933_v47 }
 0x65f   :  { %942 = vadd.xlane.f32.xlu1 %v941_v48 }
 0x6e8   :  { %v929_v50 = vpop.xlane.xlu1 %928 }
 0x6e9   :  { %v935_v51 = vpop.xlane.xlu0 %934 }
 0x6ea   :  { %v936_v52 = vadd.f32 %v935_v51, %v929_v50 }
 0x6ec   :  { %1338 = vlog2.f32 %v936_v52  ;;  %v943_v54 = vpop.xlane.xlu1 %942 }
 0x6ed   :  { %v944_v56 = vmul.f32 2.0, %v943_v54 }
 0x6f6   :  { %v1339_v53 = vpop.eup %1338 }
 0x6f7   :  { %v938_v13 = vmul.f32 0.6931472, %v1339_v53 }
 0x6f9   :  { %v939_v55 = vadd.f32 %v938_v13, %v923_v41 }
 0x6fb   :  { %v945_v57 = vsub.f32 %v939_v55, %v944_v56 }
 0x6fd   :  { %v946_v58 = vadd.f32 %v945_v57, %v945_v57 }
 0x6ff   :  { %v948_v59 = vsel %vm947_vm7, %v946_v58, 0.0 }
 0x700   :  { %v949_v60 = vrot.slane %v948_v59, 4 }
 0x702   :  { %v950_v61 = vadd.f32 %v949_v60, %v948_v59 }
 0x704   :  { %v951_v62 = vrot.slane %v950_v61, 2 }
 0x706   :  { %v952_v63 = vadd.f32 %v951_v62, %v950_v61 }
 0x708   :  { %v953_v1 = vrot.slane %v952_v63, 1 }
 0x70a   :  { %v954_v2 = vadd.f32 %v953_v1, %v952_v63 }
 0x70c   :  { %v955_v3 = vmul.f32 0.25, %v954_v2 }
 0x70e   :  { %957 = vst.msk [vmem:[#allocation2] sm:$0x1] %vm956_vm8, %v955_v3 }
 0x70f   :  { %1351 = shalt.err (!%p1348_p4)
}
 0x710   :  { %s1352_s21 = scalar_lea.hbm %s1937_s9, 16 }
 0x711   :  { %p1353_p5 = scmp.ne.s32.totalorder %s1937_s9, %s1352_s21  ;;  %p1356_p6 = scmp.lt.u32.totalorder %s1352_s21, %s1937_s9 }
 0x713   :  { %p1358_p7 = pnand %p1356_p6, %p1353_p5 }
 0x715   :  { %1361 = shalt.err (!%p1358_p7)
}
 0x716   :  { %967 = dma.vmem_to_hbm [thread:$0]  %s965_s17, 16, %s1937_s9, [#allocation3]  }
 0x717   :  { %1362 = dma.done.wait [#allocation3], 16  }
 0x718   :  { %1363 = vsyncadd [#allocation3], 4294967280 }
 0x719   :  { %971 = vsyncpa [#allocation3], 1 }

</bundles_post_ra>
